<compile_context>
chip_gen: v6e
topology: v6e:2x2x1
jax: 0.10.0
libtpu: 0.0.40
codegen_flags: <defaults>
</compile_context>

<pallas_src>
import functools
import numpy as np
import jax
import jax.numpy as jnp
from jax import lax
from jax.experimental import pallas as pl
from jax.experimental.pallas import tpu as pltpu


def pixel_index_cal_downsampling(length, width, lds, wds):
    """Exact NumPy port of PixelIndexCal_DownSampling (used by the reference)."""
    L, W = length // lds, width // wds
    ds_indices = np.zeros((lds * wds, W * L), dtype=np.int32)
    for x in range(lds):
        for y in range(wds):
            k = x * W * wds + y
            for z in range(L):
                i = z * W
                st = k + z * W * wds * lds
                ds_indices[x * wds + y, i:i + W] = np.arange(st, st + W * wds, wds)
    return ds_indices.reshape(-1)


def _build_banded_weights(conv_w, W):
    """Expand (3, 3, P, P) [kh, kw, cin, cout] conv weights into the im2row
    band of shape (3*(W+2)*P, W*P):
        band[kh*(W+2)*P + (w+kw)*P + ci, w*P + co] = conv_w[kh, kw, ci, co]."""
    P = conv_w.shape[-1]
    sel = np.zeros((3, W + 2, W), np.float32)
    for kw in range(3):
        sel[kw, kw:kw + W, :] = np.eye(W, dtype=np.float32)
    band = jnp.einsum('kjw,hkio->hjiwo', jnp.asarray(sel),
                      conv_w.astype(jnp.float32))            # (3, W+2, P, W, P)
    return band.reshape(3 * (W + 2) * P, W * P)


def _dsb_kernel(x_ref, w_ref, o_ref, *, eps, slope):
    # x_ref: (1, L, Kpad)   im2row rows (+ bias ones-column + zero pad), lane-dense
    # w_ref: (Kpad, W*P)    banded conv weights (+ tiled-bias row + zero pad)
    # o_ref: (1, L, W*P)    lane-dense output slab
    # 3x3 conv (stride 1, pad 1) + bias == ONE dense MXU matmul.
    acc = jnp.dot(x_ref[0], w_ref[...], preferred_element_type=jnp.float32)

    # GroupNorm(num_groups=1, affine=False): two-pass stats over C*H*W (robust
    # against the E[x^2]-E[x]^2 cancellation issue; acc is already resident).
    n = acc.size
    mean = jnp.sum(acc) / n
    centered = acc - mean
    var = jnp.sum(centered * centered) / n
    y = centered * lax.rsqrt(var + eps)

    # LeakyReLU(0.2)
    o_ref[0] = jnp.where(y >= 0, y, slope * y).astype(o_ref.dtype)


def downsampling_block(x, conv_w, conv_b, *, planes, lds=2, wds=2,
                       eps=1e-5, slope=0.2, mxu_dtype=jnp.float32):
    """x: (B, C, H, Wf) NCHW with C*lds*wds == planes.
    conv_w: (3, 3, planes, planes) [kh, kw, cin, cout]; conv_b: (planes,).
    Returns (B, planes, H//lds, Wf//wds) NCHW, matching the PyTorch module."""
    B, C, H, Wf = x.shape
    assert C * lds * wds == planes, "channel * lds * wds must equal planes"
    L, W = H // lds, Wf // wds
    P = planes
    N = W * P                                  # lane-dense output width
    K0 = 3 * (W + 2) * P                       # raw im2row contraction depth
    Kpad = ((K0 + 1 + 127) // 128) * 128       # +1 bias column, round to 128

    # --- wrapper glue (one pass each) ---------------------------------------
    # space-to-depth + NHWC in a single reshape+transpose; new channel order
    # c*lds*wds + dx*wds + dy matches PixelIndexCal_DownSampling exactly.
    xf = x.astype(jnp.float32).reshape(B, C, L, lds, W, wds)
    x_nhwc = jnp.transpose(xf, (0, 2, 4, 1, 3, 5)).reshape(B, L, W, P)

    # conv padding=1 outside, lane-flatten, then im2row along kh (+ bias col).
    xpad = jnp.pad(x_nhwc, ((0, 0), (1, 1), (1, 1), (0, 0)))
    xflat = xpad.reshape(B, L + 2, (W + 2) * P)
    rows = jnp.concatenate(
        [xflat[:, 0:L], xflat[:, 1:L + 1], xflat[:, 2:L + 2]], axis=-1)
    ones = jnp.ones((B, L, 1), jnp.float32)
    zpad = jnp.zeros((B, L, Kpad - K0 - 1), jnp.float32)
    lhs = jnp.concatenate([rows, ones, zpad], axis=-1).astype(mxu_dtype)

    band = _build_banded_weights(conv_w, W)                      # (K0, N)
    bias_row = jnp.tile(conv_b.astype(jnp.float32), W).reshape(1, N)
    wzpad = jnp.zeros((Kpad - K0 - 1, N), jnp.float32)
    rhs = jnp.concatenate([band, bias_row, wzpad], axis=0).astype(mxu_dtype)

    kernel = functools.partial(_dsb_kernel, eps=eps, slope=slope)
    out_flat = pl.pallas_call(
        kernel,
        out_shape=jax.ShapeDtypeStruct((B, L, N), jnp.float32),
        grid_spec=pltpu.PrefetchScalarGridSpec(
            num_scalar_prefetch=0,
            grid=(B,),
            in_specs=[
                pl.BlockSpec((1, L, Kpad), lambda b: (b, 0, 0)),
                pl.BlockSpec((Kpad, N), lambda b: (0, 0)),
            ],
            out_specs=pl.BlockSpec((1, L, N), lambda b: (b, 0, 0)),
        ),
        compiler_params=pltpu.CompilerParams(
            dimension_semantics=("parallel",),
            vmem_limit_bytes=32 * 1024 * 1024,
        ),
    )(lhs, rhs)

    out = out_flat.reshape(B, L, W, P)                           # (B, L, W, P)
    return jnp.transpose(out, (0, 3, 1, 2))                      # back to NCHW


def reference(x, conv_w, conv_b, *, planes, lds=2, wds=2, eps=1e-5, slope=0.2):
    """Pure-JAX reference of the PyTorch forward (index_select path)."""
    B, C, H, Wf = x.shape
    L, W = H // lds, Wf // wds
    ds_index = jnp.asarray(pixel_index_cal_downsampling(H, Wf, lds, wds))
    flat = x.reshape(B, C, H * Wf)
    ds = jnp.take(flat, ds_index, axis=2).reshape(B, planes, L, W)
    w_oihw = jnp.transpose(conv_w, (3, 2, 0, 1))
    conv = lax.conv_general_dilated(
        ds.astype(jnp.float32), w_oihw.astype(jnp.float32),
        window_strides=(1, 1), padding="SAME",
        dimension_numbers=("NCHW", "OIHW", "NCHW"))
    conv = conv + conv_b.reshape(1, planes, 1, 1)
    mean = conv.mean(axis=(1, 2, 3), keepdims=True)
    var = ((conv - mean) ** 2).mean(axis=(1, 2, 3), keepdims=True)
    y = (conv - mean) / jnp.sqrt(var + eps)
    return jnp.where(y >= 0, y, slope * y)


if __name__ == "__main__":
    planes, lds, wds = 8, 2, 2
    B, C, H, Wf = 2, planes // (lds * wds), 32, 32   # -> L=W=16, W*planes = 128

    key = jax.random.PRNGKey(0)
    kx, kw, kb = jax.random.split(key, 3)
    x = jax.random.normal(kx, (B, C, H, Wf), jnp.float32)
    conv_w = jax.random.normal(kw, (3, 3, planes, planes), jnp.float32) * 0.1
    conv_b = jax.random.normal(kb, (planes,), jnp.float32) * 0.1

    out = downsampling_block(x, conv_w, conv_b, planes=planes, lds=lds, wds=wds)
    out = jax.block_until_ready(out)

    ref = reference(x, conv_w, conv_b, planes=planes, lds=lds, wds=wds)
    assert out.shape == (B, planes, H // lds, Wf // wds)
    assert jnp.allclose(out, ref, atol=1e-4, rtol=1e-4), "mismatch vs reference"
    print("KERNEL_OK")
</pallas_src>

<mosaic_0001>
module attributes {stable_mosaic.version = 11 : i64} {
  func.func @_dsb_kernel(%arg0: i32, %arg1: memref<1x16x512xf32, #tpu.memory_space<vmem>>, %arg2: memref<512x128xf32, #tpu.memory_space<vmem>>, %arg3: memref<1x16x128xf32, #tpu.memory_space<vmem>>) attributes {dimension_semantics = [#tpu.dimension_semantics<parallel>], iteration_bounds = array<i64: 2>, scalar_prefetch = 0 : i64, scratch_operands = 0 : i64, tpu.core_type = #tpu.core_type<tc>, window_params = [{transform_indices = @transform_0, window_bounds = array<i64: 1, 16, 512>}, {pipeline_mode = #tpu.pipeline_mode<synchronous>, transform_indices = @transform_1, window_bounds = array<i64: 512, 128>}, {transform_indices = @transform_2, window_bounds = array<i64: 1, 16, 128>}]} {
    %c0 = arith.constant 0 : index
    %c0_0 = arith.constant 0 : index
    %c0_1 = arith.constant 0 : index
    %0 = vector.load %arg1[%c0, %c0_0, %c0_1] : memref<1x16x512xf32, #tpu.memory_space<vmem>>, vector<1x16x512xf32>
    %1 = vector.shape_cast %0 : vector<1x16x512xf32> to vector<16x512xf32>
    %c0_2 = arith.constant 0 : index
    %c0_3 = arith.constant 0 : index
    %2 = vector.load %arg2[%c0_2, %c0_3] : memref<512x128xf32, #tpu.memory_space<vmem>>, vector<512x128xf32>
    %cst = arith.constant dense<0.000000e+00> : vector<16x128xf32>
    %3 = tpu.matmul %1, %2, %cst {dimension_numbers = #tpu.dot_dimension_numbers<[1], [0], [0], [1], [0, 0, 1, 1], [], []>} : vector<16x512xf32>, vector<512x128xf32>, vector<16x128xf32> -> vector<16x128xf32>
    %4 = vector.shape_cast %3 : vector<16x128xf32> to vector<1x16x128xf32>
    %cst_4 = arith.constant dense<0.000000e+00> : vector<1xf32>
    %5 = vector.multi_reduction <add>, %4, %cst_4 [1, 2] : vector<1x16x128xf32> to vector<1xf32>
    %6 = vector.shape_cast %5 : vector<1xf32> to vector<1x1x1xf32>
    %7 = vector.extract %6[0, 0, 0] : f32 from vector<1x1x1xf32>
    %cst_5 = arith.constant 2.048000e+03 : f32
    %8 = arith.divf %7, %cst_5 : f32
    %9 = vector.broadcast %8 : f32 to vector<16x128xf32>
    %10 = arith.subf %3, %9 : vector<16x128xf32>
    %11 = arith.mulf %10, %10 : vector<16x128xf32>
    %12 = vector.shape_cast %11 : vector<16x128xf32> to vector<1x16x128xf32>
    %cst_6 = arith.constant dense<0.000000e+00> : vector<1xf32>
    %13 = vector.multi_reduction <add>, %12, %cst_6 [1, 2] : vector<1x16x128xf32> to vector<1xf32>
    %14 = vector.shape_cast %13 : vector<1xf32> to vector<1x1x1xf32>
    %15 = vector.extract %14[0, 0, 0] : f32 from vector<1x1x1xf32>
    %cst_7 = arith.constant 2.048000e+03 : f32
    %16 = arith.divf %15, %cst_7 : f32
    %cst_8 = arith.constant 9.99999974E-6 : f32
    %17 = arith.addf %16, %cst_8 : f32
    %18 = math.rsqrt %17 : f32
    %19 = vector.broadcast %18 : f32 to vector<16x128xf32>
    %20 = arith.mulf %10, %19 : vector<16x128xf32>
    %cst_9 = arith.constant 0.000000e+00 : f32
    %21 = vector.broadcast %cst_9 : f32 to vector<16x128xf32>
    %22 = arith.cmpf oge, %20, %21 : vector<16x128xf32>
    %cst_10 = arith.constant 2.000000e-01 : f32
    %23 = vector.broadcast %cst_10 : f32 to vector<16x128xf32>
    %24 = arith.mulf %23, %20 : vector<16x128xf32>
    %25 = arith.select %22, %20, %24 : vector<16x128xi1>, vector<16x128xf32>
    %c0_11 = arith.constant 0 : index
    %c0_12 = arith.constant 0 : index
    %c0_13 = arith.constant 0 : index
    %26 = vector.load %arg3[%c0_11, %c0_12, %c0_13] : memref<1x16x128xf32, #tpu.memory_space<vmem>>, vector<1x16x128xf32>
    %27 = vector.shape_cast %26 : vector<1x16x128xf32> to vector<16x128xf32>
    %28 = vector.shape_cast %25 : vector<16x128xf32> to vector<1x16x128xf32>
    tpu.vector_store %arg3[%c0_11, %c0_12, %c0_13], %28 {strides = array<i32>} : memref<1x16x128xf32, #tpu.memory_space<vmem>>, vector<1x16x128xf32>,
    return
  }
  func.func @transform_0(%arg0: i32) -> (i32, i32, i32) {
    %c0_i32 = arith.constant 0 : i32
    %c0_i32_0 = arith.constant 0 : i32
    %c0_i32_1 = arith.constant 0 : i32
    return %arg0, %c0_i32, %c0_i32_0 : i32, i32, i32
  }
  func.func @transform_1(%arg0: i32) -> (i32, i32) {
    %c0_i32 = arith.constant 0 : i32
    %c0_i32_0 = arith.constant 0 : i32
    %c0_i32_1 = arith.constant 0 : i32
    return %c0_i32, %c0_i32_0 : i32, i32
  }
  func.func @transform_2(%arg0: i32) -> (i32, i32, i32) {
    %c0_i32 = arith.constant 0 : i32
    %c0_i32_0 = arith.constant 0 : i32
    %c0_i32_1 = arith.constant 0 : i32
    return %arg0, %c0_i32, %c0_i32_0 : i32, i32, i32
  }
}

</mosaic_0001>

<bundles_post_ra>
// kernel: tpu_custom_call.1
= control target key start
LH: loop header
LB: loop body
LE: loop exit
PB: predicated region body
PF: predicated region fallthrough
CT: control target
= control target key end

     0   :  { %7 = vsyncpa [#allocation3], 0  ;;  %s1043_s0 = inlined_call_operand.hbm [shape: f32[2,16,512], index: 0, kind: input, shape index: {}]   ;;  %s1044_s1 = inlined_call_operand.hbm [shape: f32[512,128], index: 1, kind: input, shape index: {}]   ;;  %s1045_s2 = inlined_call_operand.hbm [shape: f32[2,16,128], index: 2, kind: output, shape index: {}]  }
   0x1   :  { %9 = vsyncpa [#allocation3 + $0x1], 0 }
   0x2   :  { %10 = vsyncpa [#allocation6], 0 }
   0x3   :  { %11 = vsyncpa [#allocation4], 0 }
   0x4   :  { %13 = vsyncpa [#allocation4 + $0x1], 0  ;;  %s855_s9 = smov 0   ;;  %s857_s10 = smov 0  }
   0x5   :  { %s859_s11 = smov 0   ;;  %s861_s12 = smov 0  }
   0x6 LB: > { %s876_s13 = sadd.s32 4294967295, %s829_s12   ;;  %s542_s14 = sadd.s32 4294967294, %s829_s12   ;;  %s829_s12 = sphi %s861_s12, %s1067_s12   ;;  %s825_s11 = sphi %s859_s11, %s1066_s11   ;;  %s821_s10 = sphi %s857_s10, %s1065_s10   ;;  %s817_s9 = sphi %s855_s9, %s1064_s9  }
   0x7   : > { %p39_p0 = scmp.ne.s32.totalorder %s821_s10, %s817_s9  ;;  %p1046_p1 = scmp.eq.s32.totalorder %s876_s13, 0 }
   0x8   : > { %p90_p3 = scmp.eq.s32.totalorder %s542_s14, 1  ;;  %p543_p5 = scmp.ge.s32.totalorder %s829_s12, 1 }
   0x9   : > { %p885_p4 = por %p1046_p1, %p39_p0  ;;  %p97_p7 = scmp.lt.s32.totalorder %s829_s12, 3 }
   0xa   : > { %p890_p6 = por %p90_p3, %p39_p0  ;;  %s831_s18 = smov [#allocation5]  }
   0xb   : > { %s1050_s15 = scalar_select %p885_p4, 1, 0 }
   0xc   : > { %s1051_s16 = scalar_select %p890_p6, 1, 0 }
   0xd   : > { %p895_p8 = pnand %p543_p5, %p97_p7  ;;  %s109_s19 = sshll.u32 %s831_s18, 4  ;;  %s110_s19 = int_to_ptr.vmem [resolvable:$true] %s109_s19 }
   0xe   : > { %s909_s21 = sadd.s32 1, %s829_s12   ;;  %s26_s22 = sadd.s32 1, %s825_s11 }
   0xf   : > { %s1052_s17 = scalar_select %p895_p8, 1, 0 }
  0x10   : > { %p650_p9 = pneg %p895_p8  ;;  %s23_s23 = ssub.s32 %s829_s12, %s909_s21 }
  0x11   : > { %s718_s24 = scalar_lea.vmem %s110_s19, 8192  ;;  %p726_p5 = scmp.lt.s32.totalorder %s110_s19, %s110_s19 }
  0x12   : > { %p904_p11 = pnand %p650_p9, %p1046_p1  ;;  %p719_p13 = scmp.ne.s32.totalorder %s110_s19, %s718_s24 }
  0x13   : > { %p727_p7 = scmp.lt.s32.totalorder %s718_s24, %s718_s24 }
  0x14   : > { %p709_p12 = pneg %p904_p11 }
  0x15   : > { %p728_p10 = por %p727_p7, %p726_p5 }
  0x16   : > { %p721_p0 = pnand %p719_p13, %p709_p12 }
  0x18   : > { %p722_p3 = pneg %p721_p0 }
  0x1a   : > { %p729_p2 = pnand %p728_p10, %p722_p3 }
  0x1c   : > { %732 = shalt.err (!%p729_p2)
}
  0x1d   : > { %s832_s25 = smov 128   ;;  %s833_s26 = smov 8  }
  0x1e   : > { %653 = dma.hbm_to_vmem [thread:$0]  (!%p904_p11), %s1044_s1, 8192, %s110_s19, [#allocation6], %s832_s25, %s832_s25, %s833_s26  }
  0x1f   : > { %p24_p9 = scmp.eq.s32.totalorder %s23_s23, 0  ;;  %p33_p12 = scmp.ne.s32.totalorder %s825_s11, %s821_s10 }
  0x20   : > { %p34_p10 = scmp.eq.s32.totalorder %s829_s12, 0  ;;  %p663_p2 = scmp.lt.s32.totalorder %s829_s12, 2 }
  0x21   : > { %s926_s29 = scalar_select %p24_p9, %s825_s11, %s26_s22  }
  0x22   : > { %p35_p13 = por %p34_p10, %p33_p12  ;;  %p1054_p0 = scmp.eq.s32.totalorder %s876_s13, 1 }
  0x23   : > { %s123_s3 = sand.u32 1, %s825_s11   ;;  %s558_s4 = sshll.u32 %s829_s12, 10 }
  0x24   : > { %p930_p3 = por %p1054_p0, %p33_p12  ;;  %s546_s5 = sshll.u32 %s123_s3, 6 }
  0x25   : > { %s939_s8 = scalar_lea.hbm %s1043_s0, %s558_s4  ;;  %s127_s14 = scalar_lea.vmem [#allocation2], %s546_s5 }
  0x26   : > { %s1055_s30 = scalar_select %p930_p3, 1, 0 }
  0x27   : > { %s134_s18 = sshll.u32 %s127_s14, 4  ;;  %p941_p11 = pnand %p663_p2, %p35_p13  ;;  %s945_s18 = int_to_ptr.vmem [resolvable:$true] %s134_s18 }
  0x28   : > { %s947_s20 = scalar_lea.sflag [#allocation3], %s123_s3  ;;  %s733_s22 = scalar_lea.hbm %s939_s8, 1024 }
  0x29   : > { %p734_p5 = scmp.ne.s32.totalorder %s939_s8, %s733_s22  ;;  %p735_p7 = pneg %p941_p11 }
  0x2a   : > { %s738_s25 = scalar_lea.hbm %s1043_s0, 2048  ;;  %p739_p10 = scmp.lt.s32.totalorder %s939_s8, %s1043_s0 }
  0x2b   : > { %p736_p9 = pnand %p735_p7, %p734_p5  ;;  %p740_p2 = scmp.lt.s32.totalorder %s738_s25, %s733_s22 }
  0x2d   : > { %p737_p12 = pneg %p736_p9  ;;  %p741_p13 = por %p740_p2, %p739_p10 }
  0x2f   : > { %p742_p0 = pnand %p741_p13, %p737_p12 }
  0x31   : > { %745 = shalt.err (!%p742_p0)
}
  0x32   : > { %s746_s28 = scalar_lea.vmem %s945_s18, 1024  ;;  %s834_s3 = smov [#allocation2]  }
  0x33   : > { %p747_p1 = scmp.ne.s32.totalorder %s945_s18, %s746_s28  ;;  %s751_s4 = sshll.u32 %s834_s3, 4  ;;  %s752_s4 = int_to_ptr.vmem [resolvable:$false] %s751_s4 }
  0x34   : > { %s753_s5 = scalar_lea.vmem %s752_s4, 2048  ;;  %p754_p9 = scmp.lt.s32.totalorder %s945_s18, %s752_s4 }
  0x35   : > { %p749_p6 = pnand %p747_p1, %p735_p7  ;;  %p755_p3 = scmp.lt.s32.totalorder %s753_s5, %s746_s28 }
  0x37   : > { %p750_p5 = pneg %p749_p6  ;;  %p756_p4 = por %p755_p3, %p754_p9 }
  0x39   : > { %p757_p8 = pnand %p756_p4, %p750_p5 }
  0x3b   : > { %760 = shalt.err (!%p757_p8)
}
  0x3c   : > { %s835_s6 = smov 512   ;;  %s836_s7 = smov 32  }
  0x3d   : > { %657 = dma.hbm_to_vmem [thread:$0]  (!%p941_p11), %s939_s8, 1024, %s945_s18, %s947_s20, %s835_s6, %s835_s6, %s836_s7  }
  0x3e   : > { %p1057_p1 = scmp.ne.s32.totalorder %s1052_s17, 0 }
  0x3f   : > { %s971_s14 = sand.u32 (!%p1057_p1), 1, %s821_s10   ;;  %p1058_p4 = scmp.ne.s32.totalorder (!%p1057_p1), %s1050_s15, 0 }
  0x40   : > { %146 = sbr.rel (%p1057_p1) target bundleno = 812 (0x32c), region = 28  ;;  %s550_s22 = sshll.u32 (!%p1057_p1), %s971_s14, 6 }
  0x41   : > { %s149_s23 = scalar_lea.sflag (!%p1057_p1), [#allocation3], %s971_s14  ;;  %s975_s24 = scalar_lea.vmem (!%p1057_p1), [#allocation2], %s550_s22 }
  0x45   : > { %804 = dma.done.wait (%p1058_p4), %s149_s23, 1024  }
  0x46   : > { %806 = vsyncadd (%p1058_p4), %s149_s23, 4294966272  ;;  %p1059_p6 = scmp.eq.s32.totalorder %s876_s13, 0 }
  0x48   : > { %808 = dma.done.wait (%p1059_p6), [#allocation6], 8192   ;;  %p1060_p8 = pmov %p1059_p6 }
  0x49   : > { %v216_v0 = vld [vmem:[#allocation5 + $0xf8] sm:$0xff]  ;;  %v215_v4 = vld [vmem:[#allocation5 + $0xf0] sm:$0xff]  ;;  %v214_v8 = vld [vmem:[#allocation5 + $0xe8] sm:$0xff]  ;;  %s552_s20 = sshll.u32 %s971_s14, 4  ;;  %s559_s28 = sshll.u32 %s876_s13, 8 }
  0x4a   : > { %810 = vsyncadd (%p1060_p8), [#allocation6], 4294959104  ;;  %v248_v1 = vld [vmem:[#allocation5 + $0x1f8] sm:$0xff]  ;;  %560 = vmatprep.subr.mxu0 %v216_v0  ;;  %v247_v5 = vld [vmem:[#allocation5 + $0x1f0] sm:$0xff]  ;;  %s176_s26 = scalar_lea.vmem [#allocation7], %s552_s20  ;;  %s1000_s5 = scalar_lea.hbm %s1045_s2, %s559_s28 }
  0x4b   : > { %v200_v2 = vld [vmem:[#allocation5 + $0x78] sm:$0xff]  ;;  %598 = vmatprep.subr.mxu1 %v248_v1  ;;  %v199_v6 = vld [vmem:[#allocation5 + $0x70] sm:$0xff]  ;;  %v246_v9 = vld [vmem:[#allocation5 + $0x1e8] sm:$0xff]  ;;  %s459_s27 = sshll.u32 %s176_s26, 4  ;;  %s446_s13 = scalar_lea.sflag [#allocation4], %s971_s14  ;;  %s995_s27 = int_to_ptr.vmem [resolvable:$true] %s459_s27 }
  0x4c   : > { %v232_v3 = vld [vmem:[#allocation5 + $0x178] sm:$0xff]  ;;  %561 = vmatpush3.msra.mxu0 %v200_v2  ;;  %v231_v7 = vld [vmem:[#allocation5 + $0x170] sm:$0xff]  ;;  %v198_v10 = vld [vmem:[#allocation5 + $0x68] sm:$0xff]  ;;  %s761_s6 = scalar_lea.vmem %s995_s27, 256  ;;  %p1061_p11 = scmp.ne.s32.totalorder %s1055_s30, 0 }
  0x4d   : > { %599 = vmatpush3.msra.mxu1 %v232_v3  ;;  %562 = vmatprep.subr.mxu0 %v215_v4  ;;  %v230_v11 = vld [vmem:[#allocation5 + $0x168] sm:$0xff]  ;;  %v213_v12 = vld [vmem:[#allocation5 + $0xe0] sm:$0xff]  ;;  %v212_v16 = vld [vmem:[#allocation5 + $0xd8] sm:$0xff]  ;;  %p762_p3 = scmp.ne.s32.totalorder %s995_s27, %s761_s6  ;;  %s837_s7 = smov [#allocation7]  }
  0x4e   : > { %600 = vmatprep.subr.mxu1 %v247_v5  ;;  %563 = vmatpush3.msra.mxu0 %v199_v6  ;;  %v245_v13 = vld [vmem:[#allocation5 + $0x1e0] sm:$0xff]  ;;  %v244_v17 = vld [vmem:[#allocation5 + $0x1d8] sm:$0xff]  ;;  %v211_v20 = vld [vmem:[#allocation5 + $0xd0] sm:$0xff]  ;;  %s765_s22 = sshll.u32 %s837_s7, 4  ;;  %s766_s22 = int_to_ptr.vmem [resolvable:$false] %s765_s22 }
  0x4f   : > { %601 = vmatpush3.msra.mxu1 %v231_v7  ;;  %564 = vmatprep.subr.mxu0 %v214_v8  ;;  %v197_v14 = vld [vmem:[#allocation5 + $0x60] sm:$0xff]  ;;  %v196_v18 = vld [vmem:[#allocation5 + $0x58] sm:$0xff]  ;;  %v243_v21 = vld [vmem:[#allocation5 + $0x1d0] sm:$0xff]  ;;  %p763_p7 = pnand %p762_p3, %p1061_p11  ;;  %s767_s23 = scalar_lea.vmem %s766_s22, 512 }
  0x50   : > { %602 = vmatprep.subr.mxu1 %v246_v9  ;;  %v229_v15 = vld [vmem:[#allocation5 + $0x160] sm:$0xff]  ;;  %565 = vmatpush3.msra.mxu0 %v198_v10  ;;  %v228_v19 = vld [vmem:[#allocation5 + $0x158] sm:$0xff]  ;;  %v195_v22 = vld [vmem:[#allocation5 + $0x50] sm:$0xff]  ;;  %p768_p10 = scmp.lt.s32.totalorder %s995_s27, %s766_s22  ;;  %p769_p2 = scmp.lt.s32.totalorder %s767_s23, %s761_s6 }
  0x51   : > { %603 = vmatpush3.msra.mxu1 %v230_v11  ;;  %566 = vmatprep.subr.mxu0 %v213_v12  ;;  %v227_v23 = vld [vmem:[#allocation5 + $0x150] sm:$0xff]  ;;  %v210_v24 = vld [vmem:[#allocation5 + $0xc8] sm:$0xff]  ;;  %v209_v28 = vld [vmem:[#allocation5 + $0xc0] sm:$0xff]  ;;  %p764_p12 = pneg %p763_p7 }
  0x52   : > { %604 = vmatprep.subr.mxu1 %v245_v13  ;;  %567 = vmatpush3.msra.mxu0 %v197_v14  ;;  %v242_v25 = vld [vmem:[#allocation5 + $0x1c8] sm:$0xff]  ;;  %v241_v29 = vld [vmem:[#allocation5 + $0x1c0] sm:$0xff]  ;;  %v208_v32 = vld [vmem:[#allocation5 + $0xb8] sm:$0xff]  ;;  %p770_p13 = por %p769_p2, %p768_p10 }
  0x53   : > { %605 = vmatpush3.msra.mxu1 %v229_v15  ;;  %568 = vmatprep.subr.mxu0 %v212_v16  ;;  %v194_v26 = vld [vmem:[#allocation5 + $0x48] sm:$0xff]  ;;  %v193_v30 = vld [vmem:[#allocation5 + $0x40] sm:$0xff]  ;;  %v240_v33 = vld [vmem:[#allocation5 + $0x1b8] sm:$0xff] }
  0x54   : > { %606 = vmatprep.subr.mxu1 %v244_v17  ;;  %569 = vmatpush3.msra.mxu0 %v196_v18  ;;  %v226_v27 = vld [vmem:[#allocation5 + $0x148] sm:$0xff]  ;;  %v225_v31 = vld [vmem:[#allocation5 + $0x140] sm:$0xff]  ;;  %v192_v34 = vld [vmem:[#allocation5 + $0x38] sm:$0xff]  ;;  %p771_p0 = pnand %p770_p13, %p764_p12 }
  0x55   : > { %607 = vmatpush3.msra.mxu1 %v228_v19  ;;  %570 = vmatprep.subr.mxu0 %v211_v20  ;;  %v224_v35 = vld [vmem:[#allocation5 + $0x138] sm:$0xff]  ;;  %v207_v36 = vld [vmem:[#allocation5 + $0xb0] sm:$0xff]  ;;  %v206_v40 = vld [vmem:[#allocation5 + $0xa8] sm:$0xff] }
  0x56   : > { %608 = vmatprep.subr.mxu1 %v243_v21  ;;  %571 = vmatpush3.msra.mxu0 %v195_v22  ;;  %v239_v37 = vld [vmem:[#allocation5 + $0x1b0] sm:$0xff]  ;;  %v238_v41 = vld [vmem:[#allocation5 + $0x1a8] sm:$0xff]  ;;  %v205_v44 = vld [vmem:[#allocation5 + $0xa0] sm:$0xff] }
  0x57   : > { %609 = vmatpush3.msra.mxu1 %v227_v23  ;;  %572 = vmatprep.subr.mxu0 %v210_v24  ;;  %v191_v38 = vld [vmem:[#allocation5 + $0x30] sm:$0xff]  ;;  %v190_v42 = vld [vmem:[#allocation5 + $0x28] sm:$0xff]  ;;  %v237_v45 = vld [vmem:[#allocation5 + $0x1a0] sm:$0xff] }
  0x58   : > { %610 = vmatprep.subr.mxu1 %v242_v25  ;;  %573 = vmatpush3.msra.mxu0 %v194_v26  ;;  %v223_v39 = vld [vmem:[#allocation5 + $0x130] sm:$0xff]  ;;  %v222_v43 = vld [vmem:[#allocation5 + $0x128] sm:$0xff]  ;;  %v189_v46 = vld [vmem:[#allocation5 + $0x20] sm:$0xff] }
  0x59   : > { %611 = vmatpush3.msra.mxu1 %v226_v27  ;;  %574 = vmatprep.subr.mxu0 %v209_v28  ;;  %v221_v47 = vld [vmem:[#allocation5 + $0x120] sm:$0xff]  ;;  %v204_v48 = vld [vmem:[#allocation5 + $0x98] sm:$0xff]  ;;  %v203_v52 = vld [vmem:[#allocation5 + $0x90] sm:$0xff] }
  0x5a   : > { %612 = vmatprep.subr.mxu1 %v241_v29  ;;  %575 = vmatpush3.msra.mxu0 %v193_v30  ;;  %v236_v49 = vld [vmem:[#allocation5 + $0x198] sm:$0xff]  ;;  %v235_v53 = vld [vmem:[#allocation5 + $0x190] sm:$0xff]  ;;  %v202_v56 = vld [vmem:[#allocation5 + $0x88] sm:$0xff] }
  0x5b   : > { %613 = vmatpush3.msra.mxu1 %v225_v31  ;;  %576 = vmatprep.subr.mxu0 %v208_v32  ;;  %v188_v50 = vld [vmem:[#allocation5 + $0x18] sm:$0xff]  ;;  %v187_v54 = vld [vmem:[#allocation5 + $0x10] sm:$0xff]  ;;  %v234_v57 = vld [vmem:[#allocation5 + $0x188] sm:$0xff] }
  0x5c   : > { %614 = vmatprep.subr.mxu1 %v240_v33  ;;  %577 = vmatpush3.msra.mxu0 %v192_v34  ;;  %v220_v51 = vld [vmem:[#allocation5 + $0x118] sm:$0xff]  ;;  %v219_v55 = vld [vmem:[#allocation5 + $0x110] sm:$0xff]  ;;  %v186_v58 = vld [vmem:[#allocation5 + $0x8] sm:$0xff] }
  0x5d   : > { %615 = vmatpush3.msra.mxu1 %v224_v35  ;;  %578 = vmatprep.subr.mxu0 %v207_v36  ;;  %v218_v59 = vld [vmem:[#allocation5 + $0x108] sm:$0xff]  ;;  %v201_v60 = vld [vmem:[#allocation5 + $0x80] sm:$0xff]  ;;  %v180_v1 = vld [vmem:[%s975_s24 + $0x18] sm:$0xff] }
  0x5e   : > { %616 = vmatprep.subr.mxu1 %v239_v37  ;;  %579 = vmatpush3.msra.mxu0 %v191_v38  ;;  %v233_v61 = vld [vmem:[#allocation5 + $0x180] sm:$0xff]  ;;  %v178_v63 = vld [vmem:[%s975_s24 + $0x8] sm:$0xff]  ;;  %v179_v3 = vld [vmem:[%s975_s24 + $0x10] sm:$0xff] }
  0x5f   : > { %617 = vmatpush3.msra.mxu1 %v223_v39  ;;  %580 = vmatprep.subr.mxu0 %v206_v40  ;;  %v185_v62 = vld [vmem:[#allocation5] sm:$0xff]  ;;  %v182_v4 = vld [vmem:[%s975_s24 + $0x28] sm:$0xff]  ;;  %v184_v5 = vld [vmem:[%s975_s24 + $0x38] sm:$0xff] }
  0x60   : > { %618 = vmatprep.subr.mxu1 %v238_v41  ;;  %581 = vmatpush3.msra.mxu0 %v190_v42  ;;  %v217_v0 = vld [vmem:[#allocation5 + $0x100] sm:$0xff]  ;;  %v183_v7 = vld [vmem:[%s975_s24 + $0x30] sm:$0xff] }
  0x61   : > { %619 = vmatpush3.msra.mxu1 %v222_v43  ;;  %582 = vmatprep.subr.mxu0 %v205_v44  ;;  %v177_v2 = vld [vmem:[%s975_s24] sm:$0xff] }
  0x62   : > { %620 = vmatprep.subr.mxu1 %v237_v45  ;;  %583 = vmatpush3.msra.mxu0 %v189_v46  ;;  %v181_v6 = vld [vmem:[%s975_s24 + $0x20] sm:$0xff] }
  0x63   : > { %621 = vmatpush3.msra.mxu1 %v221_v47  ;;  %584 = vmatprep.subr.mxu0 %v204_v48 }
  0x64   : > { %622 = vmatprep.subr.mxu1 %v236_v49  ;;  %585 = vmatpush3.msra.mxu0 %v188_v50 }
  0x65   : > { %623 = vmatpush3.msra.mxu1 %v220_v51  ;;  %586 = vmatprep.subr.mxu0 %v203_v52 }
  0x66   : > { %624 = vmatprep.subr.mxu1 %v235_v53  ;;  %587 = vmatpush3.msra.mxu0 %v187_v54 }
  0x67   : > { %625 = vmatpush3.msra.mxu1 %v219_v55  ;;  %588 = vmatprep.subr.mxu0 %v202_v56 }
  0x68   : > { %626 = vmatprep.subr.mxu1 %v234_v57  ;;  %589 = vmatpush3.msra.mxu0 %v186_v58 }
  0x69   : > { %627 = vmatpush3.msra.mxu1 %v218_v59  ;;  %590 = vmatprep.subr.mxu0 %v201_v60 }
  0x6a   : > { %628 = vmatprep.subr.mxu1 %v233_v61  ;;  %591 = vmatpush3.msra.mxu0 %v185_v62 }
  0x6b   : > { %313 = vmatprep.mubr.f32.mxu0 %v178_v63  ;;  %629 = vmatpush3.msra.mxu1 %v217_v0 }
  0x6c   : > { %388 = vmatprep.mubr.f32.mxu1 %v180_v1  ;;  %314 = vmatmul.mubr.f32.vlgmr.msra.gmra.mxu0 %v177_v2 }
  0x6d   : > { %389 = vmatmul.mubr.f32.vlgmr.msra.gmra.mxu1 %v179_v3  ;;  %318 = vmatprep.mubr.f32.mxu0 %v182_v4 }
  0x6e   : > { %393 = vmatprep.mubr.f32.mxu1 %v184_v5 }
  0x70   : > { %319 = vmatmul.mubr.f32.gmra.mxu0 %v181_v6 }
  0x71   : > { %394 = vmatmul.mubr.f32.gmra.mxu1 %v183_v7 }
 0x12c   : > { %v592_v8 = vpop.f32.mrf.mxu0 }
 0x12d   : > { %v630_v9 = vpop.f32.mrf.mxu1 }
 0x12e   : > { %v593_v10 = vpop.f32.mrf.mxu0 }
 0x12f   : > { %v631_v11 = vpop.f32.mrf.mxu1  ;;  %v594_v14 = vadd.f32 %v593_v10, %v592_v8 }
 0x130   : > { %v595_v12 = vpop.f32.mrf.mxu0  ;;  %v632_v15 = vadd.f32 %v631_v11, %v630_v9 }
 0x131   : > { %v633_v13 = vpop.f32.mrf.mxu1 }
 0x132   : > { %v596_v16 = vpop.f32.mrf.mxu0  ;;  %v391_v20 = vadd.f32 %v632_v15, %v594_v14 }
 0x133   : > { %v634_v17 = vpop.f32.mrf.mxu1  ;;  %v597_v18 = vadd.f32 %v596_v16, %v595_v12 }
 0x134   : > { %v635_v19 = vadd.f32 %v634_v17, %v633_v13 }
 0x136   : > { %v396_v21 = vadd.f32 %v635_v19, %v597_v18 }
 0x138   : > { %v399_v22 = vadd.f32 %v396_v21, %v391_v20 }
 0x13a   : > { %400 = vadd.xlane.f32.xlu0 %v399_v22 }
 0x1c3   : > { %v401_v23 = vpop.xlane.xlu0 %400 }
 0x1c4   : > { %v402_v24 = vrot.slane %v401_v23, 4 }
 0x1c6   : > { %v403_v25 = vadd.f32 %v402_v24, %v401_v23 }
 0x1c8   : > { %v404_v26 = vrot.slane %v403_v25, 2 }
 0x1ca   : > { %v405_v27 = vadd.f32 %v404_v26, %v403_v25 }
 0x1cc   : > { %v406_v28 = vrot.slane %v405_v27, 1 }
 0x1ce   : > { %v407_v29 = vadd.f32 %v406_v28, %v405_v27 }
 0x1d0   : > { %636 = vpush %v407_v29 }
 0x201   : > { %s637_s15 = spop %636 }
 0x202   : > { %s411_s17 = smul.f32 0.00048828125, %s637_s15 }
 0x204   : > { %v412_v30 = vstv %s411_s17 }
 0x205   : > { %v413_v31 = vsub.f32 %v391_v20, %v412_v30  ;;  %v414_v32 = vsub.f32 %v396_v21, %v412_v30 }
 0x207   : > { %v415_v33 = vmul.f32 %v413_v31, %v413_v31  ;;  %v416_v34 = vmul.f32 %v414_v32, %v414_v32 }
 0x209   : > { %v417_v35 = vadd.f32 %v416_v34, %v415_v33 }
 0x20b   : > { %418 = vadd.xlane.f32.xlu0 %v417_v35 }
 0x294   : > { %v419_v36 = vpop.xlane.xlu0 %418 }
 0x295   : > { %v420_v37 = vrot.slane %v419_v36, 4 }
 0x297   : > { %v421_v38 = vadd.f32 %v420_v37, %v419_v36 }
 0x299   : > { %v422_v39 = vrot.slane %v421_v38, 2 }
 0x29b   : > { %v423_v40 = vadd.f32 %v422_v39, %v421_v38 }
 0x29d   : > { %v424_v41 = vrot.slane %v423_v40, 1 }
 0x29f   : > { %v425_v42 = vadd.f32 %v424_v41, %v423_v40 }
 0x2a1   : > { %638 = vpush %v425_v42 }
 0x2d2   : > { %s639_s8 = spop %638 }
 0x2d3   : > { %s429_s18 = smul.f32 0.00048828125, %s639_s8 }
 0x2d5   : > { %s430_s19 = sadd.f32 1e-05, %s429_s18 }
 0x2d7   : > { %v431_v43 = vstv %s430_s19 }
 0x2d8   : > { %705 = vrsqrt.f32 %v431_v43 }
 0x2e5   : > { %v706_v44 = vpop.eup %705 }
 0x2e6   : > { %640 = vpush %v706_v44 }
 0x317   : > { %s641_s25 = spop %640 }
 0x318   : > { %v434_v45 = vstv %s641_s25 }
 0x319   : > { %v435_v46 = vmul.f32 %v434_v45, %v413_v31  ;;  %v436_v47 = vmul.f32 %v434_v45, %v414_v32 }
 0x31b   : > { %vm437_vm0 = vcmp.ge.f32.partialorder %v435_v46, 0.0  ;;  %vm438_vm1 = vcmp.ge.f32.partialorder %v436_v47, 0.0  ;;  %v439_v48 = vmul.f32 0.2, %v435_v46  ;;  %v440_v49 = vmul.f32 0.2, %v436_v47 }
 0x31d   : > { %v441_v50 = vsel %vm437_vm0, %v435_v46, %v439_v48  ;;  %v442_v51 = vsel %vm438_vm1, %v436_v47, %v440_v49 }
 0x31e   : > { %443 = vst [vmem:[%s176_s26] sm:$0xff] %v441_v50  ;;  %444 = vst [vmem:[%s176_s26 + $0x8] sm:$0xff] %v442_v51 }
 0x31f   : > { %774 = shalt.err (!%p771_p0)
}
 0x320   : > { %s775_s24 = scalar_lea.hbm %s1000_s5, 256  ;;  %s779_s8 = scalar_lea.hbm %s1045_s2, 512 }
 0x321   : > { %p776_p5 = scmp.ne.s32.totalorder %s1000_s5, %s775_s24  ;;  %p780_p4 = scmp.lt.s32.totalorder %s1000_s5, %s1045_s2 }
 0x322   : > { %p781_p6 = scmp.lt.s32.totalorder %s779_s8, %s775_s24 }
 0x323   : > { %p777_p9 = pnand %p776_p5, %p1061_p11 }
 0x324   : > { %p782_p8 = por %p781_p6, %p780_p4 }
 0x325   : > { %p778_p1 = pneg %p777_p9 }
 0x327   : > { %p783_p3 = pnand %p782_p8, %p778_p1 }
 0x329   : > { %786 = shalt.err (!%p783_p3)
}
 0x32a   : > { %s838_s20 = smov 128   ;;  %s839_s25 = smov 8  }
 0x32b   : > { %648 = dma.vmem_to_hbm [thread:$0]  (%p1061_p11), %s995_s27, 256, %s1000_s5, %s446_s13, %s838_s20, %s838_s20, %s839_s25  }
 0x32c PF: > { %s474_s26 = sand.u32 1, %s817_s9   ;;  %p1062_p7 = scmp.ne.s32.totalorder %s1051_s16, 0 }
 0x32d   : > { %p1063_p12 = scmp.ge.s32.totalorder %s829_s12, 2  ;;  %s475_s28 = scalar_lea.sflag [#allocation4], %s474_s26 }
 0x32f   : > { %p659_p10 = pnand %p1063_p12, %p1062_p7 }
 0x331   : > { %p660_p2 = pneg %p659_p10 }
 0x333   : > { %812 = dma.done.wait (%p660_p2), %s475_s28, 256  }
 0x334   : > { %814 = vsyncadd (%p660_p2), %s475_s28, 4294967040  ;;  %p16_p13 = scmp.ge.s32.totalorder %s909_s21, 4   ;;  %s1064_s9 = smov %s821_s10 }
 0x335   : > { %s1065_s10 = smov %s825_s11  ;;  %s1066_s11 = smov %s926_s29 }
 0x336   : > { %s1067_s12 = smov %s909_s21  ;;  %18 = sbr.rel (!%p16_p13) target bundleno = 6 (0x6), region = 77 }
 0x33b   :  { %480 = vsyncpa [#allocation3], 1 }
 0x33c   :  { %482 = vsyncpa [#allocation3 + $0x1], 1 }
 0x33d   :  { %483 = vsyncpa [#allocation6], 1 }
 0x33e   :  { %484 = vsyncpa [#allocation4], 1 }
 0x33f   :  { %486 = vsyncpa [#allocation4 + $0x1], 1 }

</bundles_post_ra>
